<compile_context>
chip_gen: v7x
topology: tpu7x:2x2x1
jax: 0.10.0
libtpu: 0.0.40
codegen_flags: <defaults>
</compile_context>

<pallas_src>
import functools

import jax
import jax.numpy as jnp
from jax.experimental import pallas as pl
from jax.experimental.pallas import tpu as pltpu


def _dense_block_kernel(x_ref, w_ref, bias_ref, out_ref, *,
                        cc, k, p, width, tw, negative_slope):
    """One (batch, row-block) tile per grid step.

    x_ref   : (1, 1, Cin, Lb)  haloed, height-padded, flattened x slab
                               Lb = (TH + 2p) * W + 2p
    w_ref   : (Cc, K)          BN-scale-folded conv weights, K = k*k*Cin,
                               K index = (dy*k + dx)*Cin + ci
    bias_ref: (Cc, 1)          folded BN bias (always f32)
    out_ref : (1, Cc+Cin, TW)  [branch outputs | passthrough x], TW = TH*W
    """
    buf = x_ref[0, 0]                                            # (Cin, Lb)

    # Column index (w coordinate) of every flattened output position.
    col = jax.lax.broadcasted_iota(jnp.int32, (1, tw), 1) % width

    # In-kernel im2col: tap (dy, dx) of the conv is the lane window of the
    # flattened slab starting at dy*W + dx, with columns whose source
    # w + dx - p falls outside [0, W) masked to zero (horizontal padding).
    taps = []
    for dy in range(k):
        for dx in range(k):
            s = dy * width + dx
            tap = buf[:, s:s + tw]                               # (Cin, TW)
            if dx != p:
                valid = (col >= (p - dx)) & (col < (width + p - dx))
                tap = jnp.where(valid, tap, jnp.zeros_like(tap))
            taps.append(tap)
    patches = jnp.concatenate(taps, axis=0)                      # (K, TW)

    # Single MXU matmul for all three conv branches; f32 accumulation.
    acc = jnp.dot(w_ref[...], patches,
                  preferred_element_type=jnp.float32)            # (Cc, TW)
    y = acc + bias_ref[...]                                      # folded BN bias
    y = jnp.where(y > 0, y, negative_slope * y)                  # leaky_relu

    # Two direct stores -- no output concatenate.
    out_ref[0, :cc, :] = y.astype(out_ref.dtype)
    center = p * width + p                                       # unmasked tap
    out_ref[0, cc:, :] = buf[:, center:center + tw].astype(out_ref.dtype)


def _vmem_capacity_bytes(default=128 * 1024 * 1024):
    """Physical VMEM of the attached TPU (v5e/v6e 128 MiB, v7x 64 MiB)."""
    try:
        info = pltpu.get_tpu_info()
    except Exception:
        return default
    for name in ("vmem_capacity_bytes", "vmem_size_bytes", "vmem_bytes"):
        v = getattr(info, name, None)
        if v:
            return int(v)
    return default


def _choose_row_block(H, W, cin, cc, K, p, in_item, out_item,
                      vmem_budget, min_row_blocks=1):
    """Largest TH with TH | H and (TH*W) % 128 == 0 (or TH == H) whose
    per-step VMEM plan fits the budget.  Falls back to the *smallest* legal
    tile (never blindly to the full image).  min_row_blocks keeps >= 2 grid
    points along the row axis when batch == 1 (v7x has 2 TensorCores)."""
    def tile_bytes(th):
        tw = th * W
        lb = (th + 2 * p) * W + 2 * p
        tw_p = -(-tw // 128) * 128
        lb_p = -(-lb // 128) * 128
        b = 2 * cin * lb_p * in_item              # double-buffered input slab
        b += 2 * (cc + cin) * tw_p * out_item     # double-buffered output tile
        b += K * tw_p * in_item                   # in-kernel patch matrix
        b += 4 * (cc + cin) * tw_p * 4            # acc / taps / temporaries
        return b

    valid = [th for th in range(1, H + 1)
             if H % th == 0 and ((th * W) % 128 == 0 or th == H)]
    pref = [th for th in valid if (H // th) >= min_row_blocks] or valid
    fits = [th for th in pref if tile_bytes(th) <= vmem_budget]
    return max(fits) if fits else min(pref)


def dense_block_forward(x_nchw, conv_weights, conv_biases,
                        gammas, betas, means, variances,
                        *, kernel_size, eps=1e-5, negative_slope=0.01,
                        compute_dtype=jnp.float32, out_dtype=None,
                        row_block=None):
    """conv_weights[i]: (Cout_i, Cin, k, k) PyTorch layout; NCHW in / NCHW out.

    compute_dtype: dtype of the streamed x slab / weights (bf16 halves the
                   dominant HBM term; accumulation stays f32).
    out_dtype    : dtype of the kernel output (bf16 halves the output write).
    """
    k = kernel_size
    assert k % 2 == 1, "padding = k // 2 ('same') assumes odd kernel_size"
    p = k // 2
    N, Cin, H, W = x_nchw.shape
    K = k * k * Cin
    out_dtype = x_nchw.dtype if out_dtype is None else out_dtype

    # ---- fuse the three branches and fold BatchNorm (inference) ----
    w_cat = jnp.concatenate([w.astype(jnp.float32) for w in conv_weights], 0)
    b_cat = jnp.concatenate(conv_biases, 0).astype(jnp.float32)
    gamma = jnp.concatenate(gammas, 0).astype(jnp.float32)
    beta = jnp.concatenate(betas, 0).astype(jnp.float32)
    mean = jnp.concatenate(means, 0).astype(jnp.float32)
    var = jnp.concatenate(variances, 0).astype(jnp.float32)

    scale = gamma / jnp.sqrt(var + eps)                          # (Cc,)
    bias = beta + (b_cat - mean) * scale                         # (Cc,)
    Cc = w_cat.shape[0]
    Ctot = Cc + Cin

    # Fold BN scale into the conv weights; (Cc, K) with K = (dy*k+dx)*Cin + ci.
    w_fused = w_cat * scale[:, None, None, None]
    w2 = jnp.transpose(w_fused, (0, 2, 3, 1)).reshape(Cc, K).astype(compute_dtype)
    bias_col = bias.reshape(Cc, 1)                               # f32

    # ---- per-generation VMEM budget and row-block choice ----
    cap = _vmem_capacity_bytes()
    vmem_limit = max(32 * 2**20, min(cap // 2, 96 * 2**20))
    budget = vmem_limit // 2
    in_item = jnp.dtype(compute_dtype).itemsize
    out_item = jnp.dtype(out_dtype).itemsize
    min_rb = 2 if N == 1 else 1
    if row_block is None:
        th = _choose_row_block(H, W, Cin, Cc, K, p, in_item, out_item,
                               budget, min_rb)
    else:
        th = row_block
    assert H % th == 0 and ((th * W) % 128 == 0 or th == H), th
    R = H // th
    TW = th * W
    Lb = (th + 2 * p) * W + 2 * p

    # ---- haloed, height-padded, flattened input slabs (channel-major) ----
    # Only the 2p halo rows per block are duplicated (~1.1x of x), vs the old
    # k*k=9x im2col patch array.
    x_c = x_nchw.astype(compute_dtype)
    xp = jnp.pad(x_c, ((0, 0), (0, 0), (p, p), (0, 0)))          # height pad
    flat = jnp.pad(xp.reshape(N, Cin, (H + 2 * p) * W),
                   ((0, 0), (0, 0), (p, p)))                     # corner slack
    zb = jnp.stack([flat[:, :, r * th * W: r * th * W + Lb] for r in range(R)],
                   axis=1)                                       # (N, R, Cin, Lb)

    kernel = functools.partial(_dense_block_kernel, cc=Cc, k=k, p=p,
                               width=W, tw=TW,
                               negative_slope=negative_slope)

    out_flat = pl.pallas_call(
        kernel,
        out_shape=jax.ShapeDtypeStruct((N, Ctot, H * W), out_dtype),
        grid=(N, R),
        in_specs=[
            pl.BlockSpec((1, 1, Cin, Lb), lambda n, r: (n, r, 0, 0)),
            pl.BlockSpec((Cc, K), lambda n, r: (0, 0)),
            pl.BlockSpec((Cc, 1), lambda n, r: (0, 0)),
        ],
        out_specs=pl.BlockSpec((1, Ctot, TW), lambda n, r: (n, 0, r)),
        compiler_params=pltpu.CompilerParams(
            dimension_semantics=("parallel", "parallel"),
            vmem_limit_bytes=int(vmem_limit)),
    )(zb, w2, bias_col)

    # (N, Ctot, H*W) -> (N, Ctot, H, W): a reshape, not a transpose.
    return out_flat.reshape(N, Ctot, H, W)


def _reference_forward(x_nchw, conv_weights, conv_biases,
                       gammas, betas, means, variances,
                       *, kernel_size, eps=1e-5, negative_slope=0.01):
    """Pure-JAX reference (lax conv) for correctness checking."""
    p = kernel_size // 2
    x_nhwc = jnp.transpose(x_nchw, (0, 2, 3, 1))
    outs = []
    for w, b, g, bt, m, v in zip(conv_weights, conv_biases,
                                 gammas, betas, means, variances):
        w_hwio = jnp.transpose(w, (2, 3, 1, 0))
        y = jax.lax.conv_general_dilated(
            x_nhwc, w_hwio, window_strides=(1, 1),
            padding=((p, p), (p, p)),
            dimension_numbers=("NHWC", "HWIO", "NHWC")) + b
        y = (y - m) / jnp.sqrt(v + eps) * g + bt
        y = jnp.where(y > 0, y, negative_slope * y)
        outs.append(y)
    outs.append(x_nhwc)
    return jnp.transpose(jnp.concatenate(outs, axis=-1), (0, 3, 1, 2))


if __name__ == "__main__":
    # Small shapes consistent with the module.
    N, Cin, H, W = 2, 4, 16, 16
    out_channels = 16
    kernel_size = 3

    branch_cout = [out_channels // 2, out_channels // 4, out_channels // 8]

    key = jax.random.PRNGKey(0)
    keys = jax.random.split(key, 1 + 6 * len(branch_cout))
    x = jax.random.normal(keys[0], (N, Cin, H, W), dtype=jnp.float32)

    conv_weights, conv_biases, gammas, betas, means, variances = [], [], [], [], [], []
    ki = 1
    for co in branch_cout:
        conv_weights.append(0.1 * jax.random.normal(
            keys[ki], (co, Cin, kernel_size, kernel_size), dtype=jnp.float32)); ki += 1
        conv_biases.append(0.1 * jax.random.normal(keys[ki], (co,), dtype=jnp.float32)); ki += 1
        gammas.append(1.0 + 0.1 * jax.random.normal(keys[ki], (co,), dtype=jnp.float32)); ki += 1
        betas.append(0.1 * jax.random.normal(keys[ki], (co,), dtype=jnp.float32)); ki += 1
        means.append(0.1 * jax.random.normal(keys[ki], (co,), dtype=jnp.float32)); ki += 1
        variances.append(1.0 + 0.1 * jax.random.uniform(keys[ki], (co,), dtype=jnp.float32)); ki += 1

    ref = _reference_forward(x, conv_weights, conv_biases,
                             gammas, betas, means, variances,
                             kernel_size=kernel_size)
    expected_cout = sum(branch_cout) + Cin

    # 1) f32 path, auto-chosen row block.
    out = dense_block_forward(x, conv_weights, conv_biases,
                              gammas, betas, means, variances,
                              kernel_size=kernel_size)
    out = jax.block_until_ready(out)
    assert out.shape == (N, expected_cout, H, W), out.shape
    assert jnp.allclose(out, ref, rtol=1e-4, atol=1e-4), \
        float(jnp.max(jnp.abs(out - ref)))

    # 2) f32 path with forced row tiling (R = 2) to exercise the row halo.
    out2 = jax.block_until_ready(
        dense_block_forward(x, conv_weights, conv_biases,
                            gammas, betas, means, variances,
                            kernel_size=kernel_size, row_block=8))
    assert jnp.allclose(out2, ref, rtol=1e-4, atol=1e-4), \
        float(jnp.max(jnp.abs(out2 - ref)))

    # 3) production configuration per review: bf16 streams + bf16 output
    #    (f32 accumulation).  Loose tolerance vs the f32 reference.
    out3 = jax.block_until_ready(
        dense_block_forward(x, conv_weights, conv_biases,
                            gammas, betas, means, variances,
                            kernel_size=kernel_size, row_block=8,
                            compute_dtype=jnp.bfloat16, out_dtype=jnp.bfloat16))
    assert jnp.allclose(out3.astype(jnp.float32), ref, rtol=0.1, atol=0.1), \
        float(jnp.max(jnp.abs(out3.astype(jnp.float32) - ref)))

    print("KERNEL_OK")
</pallas_src>

<mosaic_0001>
module attributes {stable_mosaic.version = 11 : i64} {
  func.func @_dense_block_kernel(%arg0: i32, %arg1: i32, %arg2: memref<1x1x4x290xf32, #tpu.memory_space<vmem>>, %arg3: memref<14x36xf32, #tpu.memory_space<vmem>>, %arg4: memref<14x1xf32, #tpu.memory_space<vmem>>, %arg5: memref<1x18x256xf32, #tpu.memory_space<vmem>>) attributes {dimension_semantics = [#tpu.dimension_semantics<parallel>, #tpu.dimension_semantics<parallel>], iteration_bounds = array<i64: 2, 1>, scalar_prefetch = 0 : i64, scratch_operands = 0 : i64, tpu.core_type = #tpu.core_type<tc>, window_params = [{transform_indices = @transform_0, window_bounds = array<i64: 1, 1, 4, 290>}, {pipeline_mode = #tpu.pipeline_mode<synchronous>, transform_indices = @transform_1, window_bounds = array<i64: 14, 36>}, {pipeline_mode = #tpu.pipeline_mode<synchronous>, transform_indices = @transform_2, window_bounds = array<i64: 14, 1>}, {transform_indices = @transform_3, window_bounds = array<i64: 1, 18, 256>}]} {
    %c0 = arith.constant 0 : index
    %c0_0 = arith.constant 0 : index
    %c0_1 = arith.constant 0 : index
    %c0_2 = arith.constant 0 : index
    %0 = vector.load %arg2[%c0, %c0_0, %c0_1, %c0_2] : memref<1x1x4x290xf32, #tpu.memory_space<vmem>>, vector<1x1x4x290xf32>
    %1 = vector.shape_cast %0 : vector<1x1x4x290xf32> to vector<4x290xf32>
    %2 = tpu.iota {dimensions = array<i32: 1>} : vector<1x256xi32>
    %c16_i32 = arith.constant 16 : i32
    %c0_i32 = arith.constant 0 : i32
    %3 = arith.cmpi eq, %c16_i32, %c0_i32 : i32
    %c1_i32 = arith.constant 1 : i32
    %4 = arith.select %3, %c1_i32, %c16_i32 : i32
    %5 = vector.broadcast %4 : i32 to vector<1x256xi32>
    %6 = arith.remsi %2, %5 : vector<1x256xi32>
    %c0_i32_3 = arith.constant 0 : i32
    %7 = vector.broadcast %c0_i32_3 : i32 to vector<1x256xi32>
    %8 = arith.cmpi ne, %6, %7 : vector<1x256xi32>
    %c0_i32_4 = arith.constant 0 : i32
    %9 = vector.broadcast %c0_i32_4 : i32 to vector<1x256xi32>
    %10 = arith.cmpi slt, %6, %9 : vector<1x256xi32>
    %c0_i32_5 = arith.constant 0 : i32
    %11 = arith.cmpi slt, %4, %c0_i32_5 : i32
    %12 = vector.broadcast %11 : i1 to vector<1x256xi1>
    %13 = vector.broadcast %12 : vector<1x256xi1> to vector<1x256xi1>
    %14 = arith.xori %10, %13 : vector<1x256xi1>
    %15 = arith.andi %14, %8 : vector<1x256xi1>
    %16 = vector.broadcast %4 : i32 to vector<1x256xi32>
    %17 = arith.addi %6, %16 : vector<1x256xi32>
    %18 = arith.select %15, %17, %6 : vector<1x256xi1>, vector<1x256xi32>
    %19 = vector.extract_strided_slice %1 {offsets = [0, 0], sizes = [4, 256], strides = [1, 1]} : vector<4x290xf32> to vector<4x256xf32>
    %c1_i32_6 = arith.constant 1 : i32
    %20 = vector.broadcast %c1_i32_6 : i32 to vector<1x256xi32>
    %21 = arith.cmpi sge, %18, %20 : vector<1x256xi32>
    %c17_i32 = arith.constant 17 : i32
    %22 = vector.broadcast %c17_i32 : i32 to vector<1x256xi32>
    %23 = arith.cmpi slt, %18, %22 : vector<1x256xi32>
    %24 = arith.andi %21, %23 : vector<1x256xi1>
    %cst = arith.constant 0.000000e+00 : f32
    %25 = vector.broadcast %cst : f32 to vector<4x256xf32>
    %26 = vector.shape_cast %24 : vector<1x256xi1> to vector<1x256xi1>
    %27 = vector.broadcast %26 : vector<1x256xi1> to vector<4x256xi1>
    %28 = arith.select %27, %19, %25 : vector<4x256xi1>, vector<4x256xf32>
    %29 = vector.extract_strided_slice %1 {offsets = [0, 1], sizes = [4, 256], strides = [1, 1]} : vector<4x290xf32> to vector<4x256xf32>
    %30 = vector.extract_strided_slice %1 {offsets = [0, 2], sizes = [4, 256], strides = [1, 1]} : vector<4x290xf32> to vector<4x256xf32>
    %c-1_i32 = arith.constant -1 : i32
    %31 = vector.broadcast %c-1_i32 : i32 to vector<1x256xi32>
    %32 = arith.cmpi sge, %18, %31 : vector<1x256xi32>
    %c15_i32 = arith.constant 15 : i32
    %33 = vector.broadcast %c15_i32 : i32 to vector<1x256xi32>
    %34 = arith.cmpi slt, %18, %33 : vector<1x256xi32>
    %35 = arith.andi %32, %34 : vector<1x256xi1>
    %cst_7 = arith.constant 0.000000e+00 : f32
    %36 = vector.broadcast %cst_7 : f32 to vector<4x256xf32>
    %37 = vector.shape_cast %35 : vector<1x256xi1> to vector<1x256xi1>
    %38 = vector.broadcast %37 : vector<1x256xi1> to vector<4x256xi1>
    %39 = arith.select %38, %30, %36 : vector<4x256xi1>, vector<4x256xf32>
    %40 = vector.extract_strided_slice %1 {offsets = [0, 16], sizes = [4, 256], strides = [1, 1]} : vector<4x290xf32> to vector<4x256xf32>
    %c1_i32_8 = arith.constant 1 : i32
    %41 = vector.broadcast %c1_i32_8 : i32 to vector<1x256xi32>
    %42 = arith.cmpi sge, %18, %41 : vector<1x256xi32>
    %c17_i32_9 = arith.constant 17 : i32
    %43 = vector.broadcast %c17_i32_9 : i32 to vector<1x256xi32>
    %44 = arith.cmpi slt, %18, %43 : vector<1x256xi32>
    %45 = arith.andi %42, %44 : vector<1x256xi1>
    %cst_10 = arith.constant 0.000000e+00 : f32
    %46 = vector.broadcast %cst_10 : f32 to vector<4x256xf32>
    %47 = vector.shape_cast %45 : vector<1x256xi1> to vector<1x256xi1>
    %48 = vector.broadcast %47 : vector<1x256xi1> to vector<4x256xi1>
    %49 = arith.select %48, %40, %46 : vector<4x256xi1>, vector<4x256xf32>
    %50 = vector.extract_strided_slice %1 {offsets = [0, 17], sizes = [4, 256], strides = [1, 1]} : vector<4x290xf32> to vector<4x256xf32>
    %51 = vector.extract_strided_slice %1 {offsets = [0, 18], sizes = [4, 256], strides = [1, 1]} : vector<4x290xf32> to vector<4x256xf32>
    %c-1_i32_11 = arith.constant -1 : i32
    %52 = vector.broadcast %c-1_i32_11 : i32 to vector<1x256xi32>
    %53 = arith.cmpi sge, %18, %52 : vector<1x256xi32>
    %c15_i32_12 = arith.constant 15 : i32
    %54 = vector.broadcast %c15_i32_12 : i32 to vector<1x256xi32>
    %55 = arith.cmpi slt, %18, %54 : vector<1x256xi32>
    %56 = arith.andi %53, %55 : vector<1x256xi1>
    %cst_13 = arith.constant 0.000000e+00 : f32
    %57 = vector.broadcast %cst_13 : f32 to vector<4x256xf32>
    %58 = vector.shape_cast %56 : vector<1x256xi1> to vector<1x256xi1>
    %59 = vector.broadcast %58 : vector<1x256xi1> to vector<4x256xi1>
    %60 = arith.select %59, %51, %57 : vector<4x256xi1>, vector<4x256xf32>
    %61 = vector.extract_strided_slice %1 {offsets = [0, 32], sizes = [4, 256], strides = [1, 1]} : vector<4x290xf32> to vector<4x256xf32>
    %c1_i32_14 = arith.constant 1 : i32
    %62 = vector.broadcast %c1_i32_14 : i32 to vector<1x256xi32>
    %63 = arith.cmpi sge, %18, %62 : vector<1x256xi32>
    %c17_i32_15 = arith.constant 17 : i32
    %64 = vector.broadcast %c17_i32_15 : i32 to vector<1x256xi32>
    %65 = arith.cmpi slt, %18, %64 : vector<1x256xi32>
    %66 = arith.andi %63, %65 : vector<1x256xi1>
    %cst_16 = arith.constant 0.000000e+00 : f32
    %67 = vector.broadcast %cst_16 : f32 to vector<4x256xf32>
    %68 = vector.shape_cast %66 : vector<1x256xi1> to vector<1x256xi1>
    %69 = vector.broadcast %68 : vector<1x256xi1> to vector<4x256xi1>
    %70 = arith.select %69, %61, %67 : vector<4x256xi1>, vector<4x256xf32>
    %71 = vector.extract_strided_slice %1 {offsets = [0, 33], sizes = [4, 256], strides = [1, 1]} : vector<4x290xf32> to vector<4x256xf32>
    %72 = vector.extract_strided_slice %1 {offsets = [0, 34], sizes = [4, 256], strides = [1, 1]} : vector<4x290xf32> to vector<4x256xf32>
    %c-1_i32_17 = arith.constant -1 : i32
    %73 = vector.broadcast %c-1_i32_17 : i32 to vector<1x256xi32>
    %74 = arith.cmpi sge, %18, %73 : vector<1x256xi32>
    %c15_i32_18 = arith.constant 15 : i32
    %75 = vector.broadcast %c15_i32_18 : i32 to vector<1x256xi32>
    %76 = arith.cmpi slt, %18, %75 : vector<1x256xi32>
    %77 = arith.andi %74, %76 : vector<1x256xi1>
    %cst_19 = arith.constant 0.000000e+00 : f32
    %78 = vector.broadcast %cst_19 : f32 to vector<4x256xf32>
    %79 = vector.shape_cast %77 : vector<1x256xi1> to vector<1x256xi1>
    %80 = vector.broadcast %79 : vector<1x256xi1> to vector<4x256xi1>
    %81 = arith.select %80, %72, %78 : vector<4x256xi1>, vector<4x256xf32>
    %82 = tpu.concatenate %28, %29, %39, %49, %50, %60, %70, %71, %81 in 0 : vector<4x256xf32>, vector<4x256xf32>, vector<4x256xf32>, vector<4x256xf32>, vector<4x256xf32>, vector<4x256xf32>, vector<4x256xf32>, vector<4x256xf32>, vector<4x256xf32> -> vector<36x256xf32>
    %c0_20 = arith.constant 0 : index
    %c0_21 = arith.constant 0 : index
    %83 = vector.load %arg3[%c0_20, %c0_21] : memref<14x36xf32, #tpu.memory_space<vmem>>, vector<14x36xf32>
    %cst_22 = arith.constant dense<0.000000e+00> : vector<14x256xf32>
    %84 = tpu.matmul %83, %82, %cst_22 {dimension_numbers = #tpu.dot_dimension_numbers<[1], [0], [0], [1], [0, 0, 1, 1], [], []>} : vector<14x36xf32>, vector<36x256xf32>, vector<14x256xf32> -> vector<14x256xf32>
    %c0_23 = arith.constant 0 : index
    %c0_24 = arith.constant 0 : index
    %85 = vector.load %arg4[%c0_23, %c0_24] : memref<14x1xf32, #tpu.memory_space<vmem>>, vector<14x1xf32>
    %86 = vector.broadcast %85 : vector<14x1xf32> to vector<14x256xf32>
    %87 = arith.addf %84, %86 : vector<14x256xf32>
    %cst_25 = arith.constant 0.000000e+00 : f32
    %88 = vector.broadcast %cst_25 : f32 to vector<14x256xf32>
    %89 = arith.cmpf ogt, %87, %88 : vector<14x256xf32>
    %cst_26 = arith.constant 0.00999999977 : f32
    %90 = vector.broadcast %cst_26 : f32 to vector<14x256xf32>
    %91 = arith.mulf %90, %87 : vector<14x256xf32>
    %92 = arith.select %89, %87, %91 : vector<14x256xi1>, vector<14x256xf32>
    %c0_27 = arith.constant 0 : index
    %c0_28 = arith.constant 0 : index
    %c0_29 = arith.constant 0 : index
    %93 = vector.load %arg5[%c0_27, %c0_28, %c0_29] : memref<1x18x256xf32, #tpu.memory_space<vmem>>, vector<1x14x256xf32>
    %94 = vector.shape_cast %93 : vector<1x14x256xf32> to vector<14x256xf32>
    %95 = vector.shape_cast %92 : vector<14x256xf32> to vector<1x14x256xf32>
    tpu.vector_store %arg5[%c0_27, %c0_28, %c0_29], %95 {strides = array<i32>} : memref<1x18x256xf32, #tpu.memory_space<vmem>>, vector<1x14x256xf32>,
    %96 = vector.extract_strided_slice %1 {offsets = [0, 17], sizes = [4, 256], strides = [1, 1]} : vector<4x290xf32> to vector<4x256xf32>
    %c0_30 = arith.constant 0 : index
    %c14 = arith.constant 14 : index
    %c0_31 = arith.constant 0 : index
    %97 = vector.load %arg5[%c0_30, %c14, %c0_31] : memref<1x18x256xf32, #tpu.memory_space<vmem>>, vector<1x4x256xf32>
    %98 = vector.shape_cast %97 : vector<1x4x256xf32> to vector<4x256xf32>
    %99 = vector.shape_cast %96 : vector<4x256xf32> to vector<1x4x256xf32>
    tpu.vector_store %arg5[%c0_30, %c14, %c0_31], %99 {strides = array<i32>} : memref<1x18x256xf32, #tpu.memory_space<vmem>>, vector<1x4x256xf32>,
    return
  }
  func.func @transform_0(%arg0: i32, %arg1: i32) -> (i32, i32, i32, i32) {
    %c0_i32 = arith.constant 0 : i32
    %c0_i32_0 = arith.constant 0 : i32
    %c0_i32_1 = arith.constant 0 : i32
    return %arg0, %arg1, %c0_i32, %c0_i32_0 : i32, i32, i32, i32
  }
  func.func @transform_1(%arg0: i32, %arg1: i32) -> (i32, i32) {
    %c0_i32 = arith.constant 0 : i32
    %c0_i32_0 = arith.constant 0 : i32
    %c0_i32_1 = arith.constant 0 : i32
    return %c0_i32, %c0_i32_0 : i32, i32
  }
  func.func @transform_2(%arg0: i32, %arg1: i32) -> (i32, i32) {
    %c0_i32 = arith.constant 0 : i32
    %c0_i32_0 = arith.constant 0 : i32
    %c0_i32_1 = arith.constant 0 : i32
    return %c0_i32, %c0_i32_0 : i32, i32
  }
  func.func @transform_3(%arg0: i32, %arg1: i32) -> (i32, i32, i32) {
    %c0_i32 = arith.constant 0 : i32
    %c0_i32_0 = arith.constant 0 : i32
    return %arg0, %c0_i32, %arg1 : i32, i32, i32
  }
}

</mosaic_0001>

<bundles_post_ra>
// kernel: tpu_custom_call.1
= control target key start
LH: loop header
LB: loop body
LE: loop exit
PB: predicated region body
PF: predicated region fallthrough
CT: control target
= control target key end

     0   :  { %8 = vsyncpa [#allocation3], 0  ;;  %s1400_s0 = inlined_call_operand.hbm [shape: f32[2,1,4,290], index: 0, kind: input, shape index: {}]   ;;  %s1401_s1 = inlined_call_operand.hbm [shape: f32[14,36], index: 1, kind: input, shape index: {}]   ;;  %s1402_s2 = inlined_call_operand.hbm [shape: f32[14,1], index: 2, kind: input, shape index: {}]   ;;  %s1403_s3 = inlined_call_operand.hbm [shape: f32[2,18,256], index: 3, kind: output, shape index: {}]  }
   0x1   :  { %10 = vsyncpa [#allocation3 + $0x1], 0 }
   0x2   :  { %11 = vsyncpa [#allocation6], 0 }
   0x3   :  { %12 = vsyncpa [#allocation4], 0 }
   0x4   :  { %14 = vsyncpa [#allocation4 + $0x1], 0  ;;  %s1055_s12 = smov 0   ;;  %s1057_s13 = smov 0  }
   0x5   :  { %s1059_s14 = smov 0   ;;  %s1061_s15 = smov 0  }
   0x6   :  { %s1063_s16 = smov 0   ;;  %s1065_s17 = smov 0  }
   0x7 LB: > { %s670_s18 = sadd.s32 4294967295, %s1015_s17   ;;  %s671_s19 = sadd.s32 4294967294, %s1015_s17   ;;  %s1015_s17 = sphi %s1065_s17, %s20_s17   ;;  %s1011_s16 = sphi %s1063_s16, %s1433_s16   ;;  %s1007_s15 = sphi %s1061_s15, %s1432_s15   ;;  %s1003_s14 = sphi %s1059_s14, %s1431_s14   ;;  %s999_s13 = sphi %s1057_s13, %s1430_s13   ;;  %s995_s12 = sphi %s1055_s12, %s1429_s12  }
   0x8   : > { %p54_p0 = scmp.ne.s32.totalorder %s999_s13, %s995_s12  ;;  %p1089_p1 = scmp.eq.s32.totalorder %s670_s18, 0 }
   0x9   : > { %p1093_p2 = scmp.eq.s32.totalorder %s670_s18, 1  ;;  %p128_p3 = scmp.eq.s32.totalorder %s671_s19, 1 }
   0xa   : > { %s1408_s20 = scalar_select %p1089_p1, 1, 0 }
   0xb   : > { %p1099_p4 = por %p1089_p1, %p54_p0  ;;  %p672_p5 = scmp.ge.s32.totalorder %s1015_s17, 1 }
   0xc   : > { %p1104_p6 = por %p128_p3, %p54_p0  ;;  %p135_p7 = scmp.lt.s32.totalorder %s1015_s17, 3 }
   0xd   : > { %s1410_s22 = scalar_select %p1099_p4, 1, 0 }
   0xe   : > { %s1411_s23 = scalar_select %p1104_p6, 1, 0 }
   0xf   : > { %p1109_p8 = pnand %p672_p5, %p135_p7  ;;  %s1017_s25 = smov [#allocation5]  }
  0x10   : > { %s147_s26 = sshll.u32 %s1017_s25, 4  ;;  %s1018_s28 = smov [#allocation7]   ;;  %s1113_s26 = int_to_ptr.vmem [resolvable:$true] %s147_s26 }
  0x11   : > { %p718_p9 = pneg %p1109_p8  ;;  %s160_s29 = sshll.u32 %s1018_s28, 4  ;;  %s1124_s29 = int_to_ptr.vmem [resolvable:$true] %s160_s29 }
  0x12   : > { %s843_s5 = scalar_lea.hbm %s1401_s1, 256 }
  0x13   : > { %p1120_p11 = pnand %p718_p9, %p1089_p1  ;;  %p844_p12 = scmp.ne.s32.totalorder %s1401_s1, %s843_s5 }
  0x14   : > { %p850_p5 = scmp.lt.u32.totalorder %s843_s5, %s1401_s1 }
  0x15   : > { %p845_p13 = pneg %p1120_p11 }
  0x17   : > { %p846_p0 = pnand %p845_p13, %p844_p12 }
  0x19   : > { %p847_p3 = pneg %p846_p0 }
  0x1b   : > { %p852_p7 = pnand %p850_p5, %p847_p3 }
  0x1d   : > { %855 = shalt.err (!%p852_p7)
}
  0x1e   : > { %s856_s10 = scalar_lea.vmem %s1113_s26, 256  ;;  %p864_p1 = scmp.lt.s32.totalorder %s1113_s26, %s1113_s26 }
  0x1f   : > { %p857_p9 = scmp.ne.s32.totalorder %s1113_s26, %s856_s10  ;;  %p865_p12 = scmp.lt.s32.totalorder %s856_s10, %s856_s10 }
  0x21   : > { %p859_p10 = pnand %p857_p9, %p845_p13  ;;  %p866_p0 = por %p865_p12, %p864_p1 }
  0x23   : > { %p860_p6 = pneg %p859_p10 }
  0x25   : > { %p867_p4 = pnand %p866_p0, %p860_p6 }
  0x27   : > { %870 = shalt.err (!%p867_p4)
}
  0x28   : > { %s1019_s11 = smov 128   ;;  %s1020_s18 = smov 8  }
  0x29   : > { %721 = dma.hbm_to_vmem [thread:$0]  (!%p1120_p11), %s1401_s1, 256, %s1113_s26, [#allocation6], %s1019_s11, %s1019_s11, %s1020_s18  }
  0x2a   : > { %s871_s4 = scalar_lea.hbm %s1402_s2, 256 }
  0x2b   : > { %p872_p1 = scmp.ne.s32.totalorder %s1402_s2, %s871_s4  ;;  %p878_p10 = scmp.lt.u32.totalorder %s871_s4, %s1402_s2 }
  0x2d   : > { %p874_p4 = pnand %p872_p1, %p845_p13 }
  0x2f   : > { %p875_p6 = pneg %p874_p4 }
  0x31   : > { %p880_p3 = pnand %p878_p10, %p875_p6 }
  0x33   : > { %883 = shalt.err (!%p880_p3)
}
  0x34   : > { %s884_s26 = scalar_lea.vmem %s1124_s29, 256  ;;  %p892_p12 = scmp.lt.s32.totalorder %s1124_s29, %s1124_s29 }
  0x35   : > { %p885_p5 = scmp.ne.s32.totalorder %s1124_s29, %s884_s26  ;;  %p893_p0 = scmp.lt.s32.totalorder %s884_s26, %s884_s26 }
  0x37   : > { %p887_p7 = pnand %p885_p5, %p845_p13  ;;  %p894_p1 = por %p893_p0, %p892_p12 }
  0x39   : > { %p888_p9 = pneg %p887_p7 }
  0x3b   : > { %p895_p4 = pnand %p894_p1, %p888_p9 }
  0x3d   : > { %898 = shalt.err (!%p895_p4)
}
  0x3e   : > { %724 = dma.hbm_to_vmem [thread:$0]  (!%p1120_p11), %s1402_s2, 256, %s1124_s29, [#allocation6], %s1019_s11, %s1019_s11, %s1020_s18  }
  0x3f   : > { %s32_s19 = sadd.s32 1, %s1011_s16  ;;  %s41_s25 = sadd.s32 1, %s1003_s14 }
  0x40   : > { %p34_p13 = scmp.ge.s32.totalorder %s32_s19, 2  ;;  %p48_p6 = scmp.ne.s32.totalorder %s1003_s14, %s999_s13 }
  0x41   : > { %p49_p10 = scmp.eq.s32.totalorder %s1015_s17, 0  ;;  %p735_p3 = scmp.lt.s32.totalorder %s1015_s17, 2 }
  0x42   : > { %s1435_s19 = smov (%p34_p13, %s32_s19), 0  ;;  %p1188_p7 = por %p1093_p2, %p48_p6 }
  0x43   : > { %p50_p5 = por %p49_p10, %p48_p6  ;;  %s36_s28 = ssub.s32 %s1011_s16, %s1435_s19 }
  0x44   : > { %s1414_s27 = scalar_select %p1188_p7, 1, 0 }
  0x45   : > { %s174_s30 = sand.u32 1, %s1003_s14   ;;  %p39_p9 = scmp.eq.s32.totalorder %s36_s28, 0 }
  0x46   : > { %s701_s29 = smul.u32 12, %s174_s30  ;;  %p1195_p11 = pnand %p735_p3, %p50_p5 }
  0x47   : > { %s1200_s18 = scalar_select %p39_p9, %s1003_s14, %s41_s25  }
  0x48   : > { %s702_s4 = smul.u32 192, %s1011_s16  ;;  %s178_s5 = scalar_lea.vmem [#allocation2], %s701_s29 }
  0x49   : > { %s188_s6 = sshll.u32 %s178_s5, 4  ;;  %s175_s26 = scalar_lea.sflag [#allocation3], %s174_s30  ;;  %s1208_s6 = int_to_ptr.vmem [resolvable:$true] %s188_s6 }
  0x4a   : > { %s1206_s8 = scalar_lea.hbm %s1400_s0, %s702_s4  ;;  %p901_p12 = pneg %p1195_p11 }
  0x4b   : > { %s899_s9 = scalar_lea.hbm %s1206_s8, 192  ;;  %s904_s28 = scalar_lea.hbm %s1400_s0, 384 }
  0x4c   : > { %p900_p2 = scmp.ne.s32.totalorder %s1206_s8, %s899_s9  ;;  %p905_p4 = scmp.lt.u32.totalorder %s1206_s8, %s1400_s0 }
  0x4d   : > { %p906_p13 = scmp.lt.u32.totalorder %s904_s28, %s899_s9  ;;  %p908_p10 = scmp.lt.u32.totalorder %s899_s9, %s1206_s8 }
  0x4e   : > { %p902_p0 = pnand %p901_p12, %p900_p2 }
  0x4f   : > { %p907_p6 = por %p906_p13, %p905_p4 }
  0x50   : > { %p903_p1 = pneg %p902_p0 }
  0x51   : > { %p909_p3 = por %p908_p10, %p907_p6 }
  0x53   : > { %p910_p5 = pnand %p909_p3, %p903_p1 }
  0x55   : > { %913 = shalt.err (!%p910_p5)
}
  0x56   : > { %s914_s30 = scalar_lea.vmem %s1208_s6, 192  ;;  %s1021_s5 = smov [#allocation2]  }
  0x57   : > { %p915_p9 = scmp.ne.s32.totalorder %s1208_s6, %s914_s30  ;;  %s919_s21 = sshll.u32 %s1021_s5, 4  ;;  %s920_s21 = int_to_ptr.vmem [resolvable:$false] %s919_s21 }
  0x58   : > { %s921_s7 = scalar_lea.vmem %s920_s21, 384  ;;  %p922_p7 = scmp.lt.s32.totalorder %s1208_s6, %s920_s21 }
  0x59   : > { %p917_p2 = pnand %p915_p9, %p901_p12  ;;  %p923_p4 = scmp.lt.s32.totalorder %s921_s7, %s914_s30 }
  0x5b   : > { %p918_p0 = pneg %p917_p2  ;;  %p924_p13 = por %p923_p4, %p922_p7 }
  0x5d   : > { %p925_p6 = pnand %p924_p13, %p918_p0 }
  0x5f   : > { %928 = shalt.err (!%p925_p6)
}
  0x60   : > { %728 = dma.hbm_to_vmem [thread:$0]  (!%p1195_p11), %s1206_s8, 192, %s1208_s6, %s175_s26  }
  0x61   : > { %197 = sbr.rel (%p1109_p8) target bundleno = 493 (0x1ed), region = 32  ;;  %s1238_s9 = sand.u32 (!%p1109_p8), 1, %s999_s13  }
  0x62   : > { %s703_s10 = smul.u32 (!%p1109_p8), 12, %s1238_s9  ;;  %s200_s25 = scalar_lea.sflag (!%p1109_p8), [#allocation3], %s1238_s9 }
  0x63   : > { %p1416_p7 = scmp.ne.s32.totalorder (!%p1109_p8), %s1410_s22, 0 }
  0x64   : > { %s203_s28 = scalar_lea.vmem (!%p1109_p8), [#allocation2], %s703_s10 }
  0x68   : > { %982 = dma.done.wait (%p1416_p7), %s200_s25, 192  }
  0x69   : > { %984 = vsyncadd (%p1416_p7), %s200_s25, 4294967104  ;;  %p1417_p12 = scmp.ne.s32.totalorder %s1408_s20, 0 }
  0x6b   : > { %986 = dma.done.wait (%p1417_p12), [#allocation6], 512  }
  0x6c   : > { %988 = vsyncadd (%p1417_p12), [#allocation6], 4294966784  ;;  %v1250_v0 = vld [vmem:[%s203_s28] sm:$0xff]  ;;  %v236_v1 = vld [vmem:[%s203_s28 + $0x8] sm:$0xf]  ;;  %s1022_s24 = smov 126   ;;  %v237_v14 = vlaneseq }
  0x6d   : > { %290 = vrot.lane.b32.xlu1 %v1250_v0, %s1022_s24  ;;  %s1023_s11 = smov 112   ;;  %v1256_v2 = vcombine.high %v1250_v0, %v1250_v0  ;;  %v356_v3 = vcombine.low %v236_v1, %v236_v1  ;;  %s1024_s20 = smov 110   ;;  %v355_v6 = vcombine.low %v1250_v0, %v1250_v0  ;;  %v1029_v7 = vmov 0.0   ;;  %v413_v9 = vld [vmem:[#allocation7] sm:$0xff]  ;;  %v414_v11 = vld [vmem:[#allocation7 + $0x8] sm:$0x3f] }
  0x6e   : > { %303 = vrot.lane.b32.xlu0 %v1250_v0, %s1023_s11  ;;  %s1025_s22 = smov 127   ;;  %s1026_s6 = smov 96   ;;  %502 = vmatprep.mubr.f32.mxu0 %v1029_v7  ;;  %v1030_v8 = vmov 0   ;;  %v531_v10 = vrot.slane %v1250_v0, 2  ;;  %v533_v13 = vrot.slane %v236_v1, 2  ;;  %v238_v15 = vand.u32 127, %v237_v14 }
  0x6f   : > { %v808_v4 = vpack.i.bf16 %v236_v1, %v1256_v2  ;;  %v813_v5 = vpack.i.bf16 %v356_v3, %v1250_v0  ;;  %s1027_s8 = smov 95   ;;  %s1028_s26 = smov 111   ;;  %508 = vmatprep.mubr.f32.mxu1 %v1029_v7  ;;  %838 = vset.pattern.permute.xlu1 %v1030_v8  ;;  %v532_v12 = vrot.slane %v1256_v2, 2  ;;  %vm309_vm0 = vcmask 916480  }
  0x70   : > { %839 = vset.pattern.permute.xlu0 %v1030_v8  ;;  %s1031_s29 = smov 94   ;;  %v239_v16 = vadd.s32 128, %v238_v15  ;;  %v244_v19 = vand.u32 15, %v238_v15  ;;  %vm296_vm4 = vcmask 1031168   ;;  %vm363_vm5 = vcmask 1039360   ;;  %s704_s4 = smul.u32 48, %s1238_s9 }
  0x71   : > { %809 = vrot.lane.b32.xlu1 %v808_v4, %s1022_s24  ;;  %vm402_vm6 = vcmask 1043456   ;;  %vm322_vm8 = vcmask 900096   ;;  %vm335_vm9 = vcmask 785408   ;;  %vm397_vm10 = vcmask 777216   ;;  %s705_s5 = smul.u32 768, %s1007_s15  ;;  %s549_s25 = scalar_lea.sflag [#allocation4], %s1238_s9 }
  0x72   : > { %804 = vrot.lane.b32.xlu0 %v808_v4, %s1023_s11  ;;  %v251_v20 = vand.u32 15, %v239_v16  ;;  %vm1273_vm2 = vcmp.ge.s32.totalorder %v244_v19, 1  ;;  %vm1291_vm7 = vcmp.lt.s32.totalorder %v244_v19, 15  ;;  %vm380_vm11 = vcmask 908288   ;;  %s1335_s30 = scalar_lea.vmem [#allocation8], %s704_s4  ;;  %p1426_p11 = scmp.ne.s32.totalorder %s1414_s27, 0 }
  0x73   : > { %v277_v46 = vsel %vm1273_vm2, %v1250_v0, 0.0  ;;  %vm348_vm12 = vcmask 769024   ;;  %vm425_vm13 = vcmask 293888   ;;  %s564_s21 = sshll.u32 %s1335_s30, 4  ;;  %s1347_s10 = scalar_lea.hbm %s1403_s3, %s705_s5  ;;  %s1342_s21 = int_to_ptr.vmem [resolvable:$true] %s564_s21 }
  0x74   : > { %vm1269_vm1 = vcmp.ge.s32.totalorder %v251_v20, 1  ;;  %vm1277_vm3 = vcmp.lt.s32.totalorder %v251_v20, 15  ;;  %s929_s28 = scalar_lea.vmem %s1342_s21, 768  ;;  %s1032_s24 = smov [#allocation8]  }
  0x75   : > { %819 = vrot.lane.b32.xlu1 %v808_v4, %s1024_s20  ;;  %v278_v39 = vsel %vm1269_vm1, %v1256_v2, 0.0  ;;  %p930_p8 = scmp.ne.s32.totalorder %s1342_s21, %s929_s28  ;;  %s933_s11 = sshll.u32 %s1032_s24, 4  ;;  %s934_s11 = int_to_ptr.vmem [resolvable:$false] %s933_s11 }
  0x76   : > { %814 = vrot.lane.b32.xlu0 %v813_v5, %s1025_s22  ;;  %p936_p3 = scmp.lt.s32.totalorder %s1342_s21, %s934_s11 }
  0x77   : > { %p931_p1 = pnand %p930_p8, %p1426_p11 }
  0x79   : > { %316 = vrot.lane.b32.xlu1 %v1250_v0, %s1024_s20  ;;  %p932_p10 = pneg %p931_p1  ;;  %s935_s20 = scalar_lea.vmem %s934_s11, 1536 }
  0x7a   : > { %357 = vrot.lane.b32.xlu0 %v355_v6, %s1025_s22  ;;  %p937_p5 = scmp.lt.s32.totalorder %s935_s20, %s929_s28 }
  0x7c   : > { %p938_p9 = por %p937_p5, %p936_p3 }
  0x7d   : > { %329 = vrot.lane.b32.xlu1 %v1250_v0, %s1026_s6 }
  0x7e   : > { %824 = vrot.lane.b32.xlu0 %v808_v4, %s1026_s6  ;;  %p939_p2 = pnand %p938_p9, %p932_p10 }
  0x81   : > { %834 = vrot.lane.b32.xlu1 %v813_v5, %s1027_s8 }
  0x82   : > { %829 = vrot.lane.b32.xlu0 %v808_v4, %s1028_s26 }
  0x85   : > { %391 = vrot.lane.b32.xlu1 %v355_v6, %s1027_s8 }
  0x86   : > { %374 = vrot.lane.b32.xlu0 %v1250_v0, %s1028_s26 }
  0x89   : > { %346 = vrot.lane.b32.xlu1 %v236_v1, %s1031_s29 }
  0x8a   : > { %344 = vrot.lane.b32.xlu0 %v1256_v2, %s1031_s29 }
  0x8d   : > { %417 = vperm.xlu1 %838, %v413_v9  }
  0x8e   : > { %342 = vrot.lane.b32.xlu0 %v1250_v0, %s1031_s29 }
  0x91   : > { %534 = vrot.lane.b32.xlu1 %v531_v10, %s1028_s26 }
  0x92   : > { %422 = vperm.xlu0 %839, %v414_v11  }
  0x95   : > { %536 = vrot.lane.b32.xlu1 %v532_v12, %s1028_s26 }
  0x96   : > { %538 = vrot.lane.b32.xlu0 %v533_v13, %s1028_s26 }
  0xdf   : > { %v291_v17 = vpop.permute.xlu1 %290 }
  0xe0   : > { %v304_v18 = vpop.permute.xlu0 %303 }
  0xe3   : > { %v810_v21 = vpop.permute.xlu1 %809 }
  0xe4   : > { %v805_v22 = vpop.permute.xlu0 %804  ;;  %v812_v25 = vunpack.i.h.bf16 %v810_v21  ;;  %v811_v26 = vunpack.i.l.bf16 %v810_v21 }
  0xe5   : > { %v807_v27 = vunpack.i.h.bf16 %v805_v22  ;;  %v806_v28 = vunpack.i.l.bf16 %v805_v22 }
  0xe6   : > { %v298_v32 = vsel %vm296_vm4, %v811_v26, %v812_v25  ;;  %v297_v43 = vsel %vm296_vm4, %v291_v17, %v811_v26 }
  0xe7   : > { %v310_v30 = vsel %vm309_vm0, %v304_v18, %v806_v28  ;;  %v311_v31 = vsel %vm309_vm0, %v806_v28, %v807_v27  ;;  %v820_v33 = vpop.permute.xlu1 %819  ;;  %v302_v40 = vsel %vm1277_vm3, %v298_v32, 0.0  ;;  %v301_v55 = vsel %vm1291_vm7, %v297_v43, 0.0 }
  0xe8   : > { %v815_v34 = vpop.permute.xlu0 %814  ;;  %v315_v35 = vsel %vm1269_vm1, %v311_v31, 0.0  ;;  %v314_v36 = vsel %vm1273_vm2, %v310_v30, 0.0  ;;  %v822_v47 = vunpack.i.h.bf16 %v820_v33  ;;  %v821_v48 = vunpack.i.l.bf16 %v820_v33 }
  0xe9   : > { %v817_v37 = vunpack.i.h.bf16 %v815_v34  ;;  %v816_v38 = vunpack.i.l.bf16 %v815_v34  ;;  %v371_v42 = vrot.slane %v315_v35, 4  ;;  %v370_v44 = vrot.slane %v314_v36, 4  ;;  %v411_v34 = vld [vmem:[#allocation5] sm:$0xff]  ;;  %v412_v35 = vld [vmem:[#allocation5 + $0x8] sm:$0x3f] }
  0xea   : > { %v324_v59 = vsel %vm322_vm8, %v821_v48, %v822_v47 }
  0xeb   : > { %v365_v45 = vsel %vm363_vm5, %v816_v38, %v817_v37  ;;  %v317_v49 = vpop.permute.xlu1 %316  ;;  %v406_v52 = vsel %vm402_vm6, %v302_v40, %v371_v42  ;;  %v405_v57 = vsel %vm402_vm6, %v301_v55, %v370_v44  ;;  %v328_v1 = vsel %vm1277_vm3, %v324_v59, 0.0 }
  0xec   : > { %v358_v50 = vpop.permute.xlu0 %357  ;;  %v404_v51 = vsel %vm402_vm6, %v278_v39, %v365_v45  ;;  %v323_v62 = vsel %vm322_vm8, %v317_v49, %v821_v48  ;;  %v388_v11 = vrot.slane %v328_v1, 4 }
  0xed   : > { %v364_v53 = vsel %vm363_vm5, %v358_v50, %v816_v38  ;;  %v687_v54 = vpack.c.bf16 %v406_v52, %v404_v51  ;;  %v327_v2 = vsel %vm1291_vm7, %v323_v62, 0.0 }
  0xee   : > { %v403_v56 = vsel %vm402_vm6, %v277_v46, %v364_v53  ;;  %v387_v15 = vrot.slane %v327_v2, 4 }
  0xef   : > { %688 = vmatprep.subr.bf16.mxu0 %v687_v54  ;;  %695 = vmatprep.subr.bf16.mxu1 %v687_v54  ;;  %v689_v58 = vpack.c.bf16 %v405_v57, %v403_v56  ;;  %v330_v60 = vpop.permute.xlu1 %329 }
  0xf0   : > { %v825_v61 = vpop.permute.xlu0 %824 }
  0xf1   : > { %v827_v63 = vunpack.i.h.bf16 %v825_v61  ;;  %v826_v0 = vunpack.i.l.bf16 %v825_v61  ;;  %690 = vmatpush1.bf16.msra.mxu0 %v689_v58  ;;  %698 = vmatpush1.bf16.msra.mxu1 %v689_v58 }
  0xf3   : > { %v337_v3 = vsel %vm335_vm9, %v826_v0, %v827_v63  ;;  %v835_v4 = vpop.permute.xlu1 %834  ;;  %v336_v10 = vsel %vm335_vm9, %v330_v60, %v826_v0 }
  0xf4   : > { %v830_v5 = vpop.permute.xlu0 %829  ;;  %v837_v6 = vunpack.i.h.bf16 %v835_v4  ;;  %v836_v7 = vunpack.i.l.bf16 %v835_v4  ;;  %v341_v13 = vsel %vm1269_vm1, %v337_v3, 0.0  ;;  %v340_v20 = vsel %vm1273_vm2, %v336_v10, 0.0 }
  0xf5   : > { %v832_v8 = vunpack.i.h.bf16 %v830_v5  ;;  %v831_v9 = vunpack.i.l.bf16 %v830_v5 }
  0xf6   : > { %v399_v12 = vsel %vm397_vm10, %v836_v7, %v837_v6 }
  0xf7   : > { %v382_v14 = vsel %vm380_vm11, %v831_v9, %v832_v8  ;;  %v392_v16 = vpop.permute.xlu1 %391  ;;  %v410_v19 = vsel %vm402_vm6, %v341_v13, %v399_v12 }
  0xf8   : > { %v375_v17 = vpop.permute.xlu0 %374  ;;  %v408_v18 = vsel %vm402_vm6, %v382_v14, %v388_v11  ;;  %v398_v21 = vsel %vm397_vm10, %v392_v16, %v836_v7 }
  0xf9   : > { %v381_v22 = vsel %vm380_vm11, %v375_v17, %v831_v9  ;;  %v691_v25 = vpack.c.bf16 %v410_v19, %v408_v18  ;;  %v409_v23 = vsel %vm402_vm6, %v340_v20, %v398_v21 }
  0xfa   : > { %v407_v26 = vsel %vm402_vm6, %v381_v22, %v387_v15 }
  0xfb   : > { %692 = vmatprep.subr.bf16.mxu0 %v691_v25  ;;  %696 = vmatprep.subr.bf16.mxu1 %v691_v25  ;;  %v693_v27 = vpack.c.bf16 %v409_v23, %v407_v26  ;;  %v347_v28 = vpop.permute.xlu1 %346 }
  0xfc   : > { %v345_v30 = vpop.permute.xlu0 %344 }
  0xfd   : > { %v350_v31 = vsel %vm348_vm12, %v345_v30, %v347_v28  ;;  %694 = vmatpush1.bf16.msra.mxu0 %v693_v27  ;;  %699 = vmatpush1.bf16.msra.mxu1 %v693_v27 }
  0xfe   : > { %v354_v24 = vsel %vm1277_vm3, %v350_v31, 0.0 }
  0xff   : > { %680 = vmatprep.subr.msk.mxu0 %vm402_vm6, %v354_v24  ;;  %697 = vmatprep.subr.msk.mxu1 %vm402_vm6, %v354_v24 }
 0x100   : > { %v343_v32 = vpop.permute.xlu0 %342 }
 0x101   : > { %v349_v33 = vsel %vm348_vm12, %v343_v32, %v345_v30 }
 0x102   : > { %v353_v36 = vsel %vm1291_vm7, %v349_v33, 0.0 }
 0x103   : > { %681 = vmatpush1.msk.msra.mxu0 %vm402_vm6, %v353_v36  ;;  %700 = vmatpush1.msk.msra.mxu1 %vm402_vm6, %v353_v36 }
 0x104   : > { %682 = vmatmul.mubr.msk.f32.vlgmr.msra.gmra.mrb[0].mxu0 %vm425_vm13, %v411_v34  ;;  %683 = vmatmul.mubr.msk.f32.vlgmr.msra.gmra.mrb[0].mxu1 %vm425_vm13, %v412_v35 }
 0x10c   : > { %v418_v29 = vpop.permute.xlu1 %417 }
 0x110   : > { %v535_v37 = vpop.permute.xlu1 %534 }
 0x111   : > { %v423_v38 = vpop.permute.xlu0 %422 }
 0x114   : > { %v537_v39 = vpop.permute.xlu1 %536 }
 0x115   : > { %v540_v40 = vsel %vm380_vm11, %v535_v37, %v537_v39  ;;  %v539_v41 = vpop.permute.xlu0 %538 }
 0x116   : > { %544 = vst [vmem:[%s1335_s30 + $0x20] ss:$-12 sps:$4 sm:$0xc3] %v540_v40   ;;  %v541_v42 = vsel %vm380_vm11, %v537_v39, %v539_v41 }
 0x117   : > { %545 = vst [vmem:[%s1335_s30 + $0x28] ss:$-12 sps:$4 sm:$0xc3] %v541_v42  }
 0x1d7   : > { %v504_v43 = vpop.f32.mrb[0].mxu0  ;;  %v510_v44 = vpop.f32.mrb[0].mxu1 }
 0x1d8   : > { %v505_v45 = vadd.f32 %v504_v43, %v418_v29  ;;  %v511_v46 = vadd.f32 %v510_v44, %v423_v38  ;;  %v506_v47 = vpop.f32.mrb[1].mxu0  ;;  %v512_v48 = vpop.f32.mrb[1].mxu1 }
 0x1d9   : > { %v507_v49 = vadd.f32 %v506_v47, %v418_v29  ;;  %v513_v50 = vadd.f32 %v512_v48, %v423_v38 }
 0x1da   : > { %vm515_vm14 = vcmp.gt.f32.partialorder %v505_v45, 0.0  ;;  %v519_v51 = vmul.f32 0.01, %v505_v45  ;;  %vm517_vm15 = vcmp.gt.f32.partialorder %v511_v46, 0.0  ;;  %v521_v52 = vmul.f32 0.01, %v511_v46 }
 0x1db   : > { %vm516_vm0 = vcmp.gt.f32.partialorder %v507_v49, 0.0  ;;  %v520_v53 = vmul.f32 0.01, %v507_v49  ;;  %vm518_vm1 = vcmp.gt.f32.partialorder %v513_v50, 0.0  ;;  %v522_v54 = vmul.f32 0.01, %v513_v50 }
 0x1dc   : > { %v523_v55 = vsel %vm515_vm14, %v505_v45, %v519_v51  ;;  %v525_v56 = vsel %vm517_vm15, %v511_v46, %v521_v52 }
 0x1dd   : > { %527 = vst [vmem:[%s1335_s30] sm:$0xff] %v523_v55  ;;  %529 = vst [vmem:[%s1335_s30 + $0x10] sm:$0x3f] %v525_v56  ;;  %v524_v57 = vsel %vm516_vm0, %v507_v49, %v520_v53  ;;  %v526_v58 = vsel %vm518_vm1, %v513_v50, %v522_v54 }
 0x1de   : > { %528 = vst [vmem:[%s1335_s30 + $0x8] sm:$0xff] %v524_v57  ;;  %530 = vst [vmem:[%s1335_s30 + $0x18] sm:$0x3f] %v526_v58 }
 0x1df   : > { %942 = shalt.err (!%p939_p2)
}
 0x1e0   : > { %s943_s22 = scalar_lea.hbm %s1347_s10, 768  ;;  %s947_s26 = scalar_lea.hbm %s1403_s3, 1536 }
 0x1e1   : > { %p944_p0 = scmp.ne.s32.totalorder %s1347_s10, %s943_s22  ;;  %p948_p6 = scmp.lt.u32.totalorder %s1347_s10, %s1403_s3 }
 0x1e2   : > { %p949_p7 = scmp.lt.u32.totalorder %s947_s26, %s943_s22  ;;  %p951_p8 = scmp.lt.u32.totalorder %s943_s22, %s1347_s10 }
 0x1e3   : > { %p945_p4 = pnand %p944_p0, %p1426_p11 }
 0x1e4   : > { %p950_p12 = por %p949_p7, %p948_p6 }
 0x1e5   : > { %p946_p13 = pneg %p945_p4 }
 0x1e6   : > { %p952_p1 = por %p951_p8, %p950_p12 }
 0x1e8   : > { %p953_p10 = pnand %p952_p1, %p946_p13 }
 0x1ea   : > { %956 = shalt.err (!%p953_p10)
}
 0x1eb   : > { %s1033_s30 = smov 256   ;;  %s1034_s5 = smov 16  }
 0x1ec   : > { %716 = dma.vmem_to_hbm [thread:$0]  (%p1426_p11), %s1342_s21, 768, %s1347_s10, %s549_s25, %s1033_s30, %s1033_s30, %s1034_s5  }
 0x1ed PF: > { %s579_s15 = sand.u32 1, %s995_s12   ;;  %p1427_p3 = scmp.ne.s32.totalorder %s1411_s23, 0 }
 0x1ee   : > { %p1428_p5 = scmp.ge.s32.totalorder %s1015_s17, 2  ;;  %s580_s7 = scalar_lea.sflag [#allocation4], %s579_s15 }
 0x1f0   : > { %p730_p9 = pnand %p1428_p5, %p1427_p3 }
 0x1f2   : > { %990 = dma.done.wait (!%p730_p9), %s580_s7, 768  }
 0x1f3   : > { %992 = vsyncadd (!%p730_p9), %s580_s7, 4294966528  ;;  %s20_s17 = sadd.s32 1, %s1015_s17   ;;  %s1429_s12 = smov %s999_s13 }
 0x1f4   : > { %p17_p2 = scmp.ge.s32.totalorder %s20_s17, 4   ;;  %s1430_s13 = smov %s1003_s14 }
 0x1f5   : > { %s1431_s14 = smov %s1200_s18  ;;  %s1432_s15 = smov %s1011_s16 }
 0x1f6   : > { %s1433_s16 = smov %s1435_s19  ;;  %19 = sbr.rel (!%p17_p2) target bundleno = 7 (0x7), region = 85 }
 0x1fd   :  { %585 = vsyncpa [#allocation3], 1 }
 0x1fe   :  { %587 = vsyncpa [#allocation3 + $0x1], 1 }
 0x1ff   :  { %588 = vsyncpa [#allocation6], 1 }
 0x200   :  { %589 = vsyncpa [#allocation4], 1 }
 0x201   :  { %591 = vsyncpa [#allocation4 + $0x1], 1 }

</bundles_post_ra>
